<compile_context>
chip_gen: v7x
topology: tpu7x:2x2x1
jax: 0.10.0
libtpu: 0.0.40
codegen_flags: <defaults>
</compile_context>

<pallas_src>
import functools

import jax
import jax.numpy as jnp
from jax import lax
from jax.experimental import pallas as pl
from jax.experimental.pallas import tpu as pltpu


def _tpu_generation():
    try:
        kind = jax.devices()[0].device_kind.lower()
    except Exception:
        return 0
    for g in (7, 6, 5, 4):
        if str(g) in kind:
            return g
    return 0


def _ce_kernel(logits_ref, tgt_ref, loss_ref, cnt_ref, loss_acc, cnt_acc, *,
               ignore_label, num_rows, tile_rows, h_steps_per_core,
               needs_row_mask):
    nb = pl.program_id(1)      # batch element
    step = pl.program_id(2)    # row-tile step within this core's range

    # Per-core accumulators, initialized on the first step of this core's grid.
    @pl.when(jnp.logical_and(nb == 0, step == 0))
    def _():
        loss_acc[...] = jnp.zeros_like(loss_acc)
        cnt_acc[...] = jnp.zeros_like(cnt_acc)

    x = logits_ref[...].astype(jnp.float32)   # (C, tile_rows, W)
    t = tgt_ref[...]                          # (tile_rows, W) int32

    # logsumexp over the class axis (leading axis -> elementwise VPU adds
    # across the C vreg slices; results are full-occupancy (tile_rows, W)).
    m = jnp.max(x, axis=0)                                      # (tile_rows, W)
    lse = m + jnp.log(jnp.sum(jnp.exp(x - m[None]), axis=0))    # (tile_rows, W)

    # Target-class logit via one-hot compare.  The iota is only (C, 1, 1) and
    # gets broadcast inside the compare (no full (C, tile) iota per step).
    cls = lax.broadcasted_iota(jnp.int32, (x.shape[0], 1, 1), 0)
    picked = jnp.sum(jnp.where(cls == t[None], x, 0.0), axis=0)  # (tile_rows, W)

    valid = t != ignore_label
    if needs_row_mask:
        # Mask rows past H (partial last tile / phantom core-split steps).
        h0 = (pl.program_id(0) * h_steps_per_core + step) * tile_rows
        row = h0 + lax.broadcasted_iota(jnp.int32, t.shape, 0)
        valid = jnp.logical_and(valid, row < num_rows)

    loss_acc[...] += jnp.where(valid, lse - picked, 0.0)
    cnt_acc[...] += valid.astype(jnp.float32)

    # Single cross-lane/sublane reduce + lane-dense output store, only on the
    # last step of this core's sub-grid.
    @pl.when(jnp.logical_and(nb == pl.num_programs(1) - 1,
                             step == pl.num_programs(2) - 1))
    def _():
        loss_ref[...] = jnp.broadcast_to(jnp.sum(loss_acc[...]), loss_ref.shape)
        cnt_ref[...] = jnp.broadcast_to(jnp.sum(cnt_acc[...]), cnt_ref.shape)


def _choose_tile_rows(H, W, C, itemsize, budget_bytes, max_pixels):
    # Double-buffered logits rows + target rows per h-row.
    per_row = 2 * (C * W * itemsize + W * 4)
    th = int(budget_bytes // max(per_row, 1))
    th = min(th, max(1, max_pixels // max(W, 1)))
    th = max(1, th)
    if th >= H or H <= 8:
        return H                      # full-dim block (always legal)
    return max(8, (th // 8) * 8)      # second-minor block dim: multiple of 8


def _cross_entropy_nchw(score, target, ignore_label):
    N, C, H, W = score.shape
    gen = _tpu_generation()
    splits = 2 if gen >= 7 else 1                       # megacore only on v7x
    budget = (16 if gen >= 7 else 8) * 1024 * 1024      # per-tile DMA budget
    max_pix = (64 if gen >= 7 else 32) * 1024           # pixels per tile cap
    vmem_limit = (44 if gen >= 7 else 32) * 1024 * 1024

    th = _choose_tile_rows(H, W, C, score.dtype.itemsize, budget, max_pix)
    total_blocks = pl.cdiv(H, th)
    spc = pl.cdiv(total_blocks, splits)                 # h-steps per core
    max_blk = total_blocks - 1
    needs_row_mask = splits * spc * th > H

    target = target.astype(jnp.int32)
    out_w = splits * 128    # one 128-lane slab per core (lane-dense store)

    def logits_map(c, nb, i):
        return (nb, 0, jnp.minimum(c * spc + i, max_blk), 0)

    def tgt_map(c, nb, i):
        return (nb, jnp.minimum(c * spc + i, max_blk), 0)

    loss_out, cnt_out = pl.pallas_call(
        functools.partial(_ce_kernel, ignore_label=ignore_label, num_rows=H,
                          tile_rows=th, h_steps_per_core=spc,
                          needs_row_mask=needs_row_mask),
        out_shape=(jax.ShapeDtypeStruct((1, out_w), jnp.float32),
                   jax.ShapeDtypeStruct((1, out_w), jnp.float32)),
        grid_spec=pltpu.PrefetchScalarGridSpec(
            num_scalar_prefetch=0,
            grid=(splits, N, spc),
            in_specs=[
                pl.BlockSpec((None, C, th, W), logits_map),   # native NCHW
                pl.BlockSpec((None, th, W), tgt_map),         # native NHW
            ],
            out_specs=[
                pl.BlockSpec((1, 128), lambda c, nb, i: (0, c)),
                pl.BlockSpec((1, 128), lambda c, nb, i: (0, c)),
            ],
            scratch_shapes=[
                pltpu.VMEM((th, W), jnp.float32),   # loss accumulator
                pltpu.VMEM((th, W), jnp.float32),   # valid-count accumulator
            ],
        ),
        compiler_params=pltpu.CompilerParams(
            dimension_semantics=("parallel", "arbitrary", "arbitrary"),
            vmem_limit_bytes=vmem_limit,
        ),
    )(score, target)

    # Each core broadcast its partial scalar across its 128-lane slab.
    loss_parts = loss_out.reshape(splits, 128)[:, 0]
    cnt_parts = cnt_out.reshape(splits, 128)[:, 0]
    # torch.nn.CrossEntropyLoss(weight=None, ignore_index): mean over the
    # non-ignored pixels (0/0 -> NaN if every pixel is ignored, same as torch).
    return jnp.sum(loss_parts) / jnp.sum(cnt_parts)


class CrossEntropy:
    """JAX/Pallas port of lib/core/criterion.py::CrossEntropy (weight=None)."""

    def __init__(self, ignore_label=-1, weight=None):
        self.ignore_label = ignore_label
        # TODO(synk): per-class `weight` vector is not implemented (module default is None).

    def __call__(self, score, target):
        # score: (N, C, H', W') float logits (f32 or bf16 — dtype is preserved,
        # the kernel upcasts to f32; bf16 ingestion halves the HBM read).
        # target: (N, H, W) int labels.
        n, c, ph, pw = score.shape
        h, w = target.shape[1], target.shape[2]
        if ph != h or pw != w:
            # F.upsample(mode='bilinear') default (align_corners=False) matches
            # jax.image.resize's half-pixel-center bilinear.
            score = jax.image.resize(score, (n, c, h, w), method="bilinear")
        # No transpose / reshape: the kernel consumes native NCHW directly.
        return _cross_entropy_nchw(score, target, self.ignore_label)


if __name__ == "__main__":
    key = jax.random.PRNGKey(0)
    k_score, k_tgt, k_ign = jax.random.split(key, 3)

    N, C = 2, 19          # typical segmentation head (e.g. 19 Cityscapes classes)
    PH = PW = 8           # prediction spatial size
    H = W = 16            # target spatial size (forces the bilinear upsample path)

    score = jax.random.normal(k_score, (N, C, PH, PW), dtype=jnp.float32)
    target = jax.random.randint(k_tgt, (N, H, W), 0, C, dtype=jnp.int32)
    # Sprinkle in some ignore_label (-1) pixels.
    ignore_mask = jax.random.bernoulli(k_ign, 0.1, (N, H, W))
    target = jnp.where(ignore_mask, jnp.int32(-1), target)

    criterion = CrossEntropy(ignore_label=-1)
    loss = criterion(score, target)
    jax.block_until_ready(loss)
    assert loss.shape == () and jnp.isfinite(loss)
    print("KERNEL_OK")
</pallas_src>

<mosaic_0001>
module attributes {stable_mosaic.version = 11 : i64} {
  func.func @_ce_kernel(%arg0: i32, %arg1: i32, %arg2: i32, %arg3: memref<1x19x16x16xf32, #tpu.memory_space<vmem>>, %arg4: memref<1x16x16xi32, #tpu.memory_space<vmem>>, %arg5: memref<1x128xf32, #tpu.memory_space<vmem>>, %arg6: memref<1x128xf32, #tpu.memory_space<vmem>>, %arg7: memref<16x16xf32, #tpu.memory_space<vmem>>, %arg8: memref<16x16xf32, #tpu.memory_space<vmem>>) attributes {dimension_semantics = [#tpu.dimension_semantics<parallel>, #tpu.dimension_semantics<arbitrary>, #tpu.dimension_semantics<arbitrary>], iteration_bounds = array<i64: 1, 2, 1>, scalar_prefetch = 0 : i64, scratch_operands = 2 : i64, tpu.core_type = #tpu.core_type<tc>, window_params = [{transform_indices = @transform_0, window_bounds = array<i64: 1, 19, 16, 16>}, {transform_indices = @transform_1, window_bounds = array<i64: 1, 16, 16>}, {transform_indices = @transform_2, window_bounds = array<i64: 1, 128>}, {transform_indices = @transform_3, window_bounds = array<i64: 1, 128>}]} {
    %c0_i32 = arith.constant 0 : i32
    %0 = arith.cmpi eq, %arg1, %c0_i32 : i32
    %c0_i32_0 = arith.constant 0 : i32
    %1 = arith.cmpi eq, %arg2, %c0_i32_0 : i32
    %2 = arith.andi %0, %1 : i1
    %3 = arith.extui %2 : i1 to i32
    %c0_i32_1 = arith.constant 0 : i32
    %4 = arith.cmpi ne, %3, %c0_i32_1 : i32
    scf.if %4 {
      %cst_22 = arith.constant 0.000000e+00 : f32
      %43 = vector.broadcast %cst_22 : f32 to vector<16x16xf32>
      %c0_23 = arith.constant 0 : index
      %c0_24 = arith.constant 0 : index
      %44 = vector.load %arg7[%c0_23, %c0_24] : memref<16x16xf32, #tpu.memory_space<vmem>>, vector<16x16xf32>
      tpu.vector_store %arg7[%c0_23, %c0_24], %43 {strides = array<i32>} : memref<16x16xf32, #tpu.memory_space<vmem>>, vector<16x16xf32>,
      %cst_25 = arith.constant 0.000000e+00 : f32
      %45 = vector.broadcast %cst_25 : f32 to vector<16x16xf32>
      %c0_26 = arith.constant 0 : index
      %c0_27 = arith.constant 0 : index
      %46 = vector.load %arg8[%c0_26, %c0_27] : memref<16x16xf32, #tpu.memory_space<vmem>>, vector<16x16xf32>
      tpu.vector_store %arg8[%c0_26, %c0_27], %45 {strides = array<i32>} : memref<16x16xf32, #tpu.memory_space<vmem>>, vector<16x16xf32>,
    } else {
    }
    %c0 = arith.constant 0 : index
    %c0_2 = arith.constant 0 : index
    %c0_3 = arith.constant 0 : index
    %c0_4 = arith.constant 0 : index
    %5 = vector.load %arg3[%c0, %c0_2, %c0_3, %c0_4] : memref<1x19x16x16xf32, #tpu.memory_space<vmem>>, vector<1x19x16x16xf32>
    %6 = vector.shape_cast %5 : vector<1x19x16x16xf32> to vector<19x16x16xf32>
    %c0_5 = arith.constant 0 : index
    %c0_6 = arith.constant 0 : index
    %c0_7 = arith.constant 0 : index
    %7 = vector.load %arg4[%c0_5, %c0_6, %c0_7] : memref<1x16x16xi32, #tpu.memory_space<vmem>>, vector<1x16x16xi32>
    %8 = vector.shape_cast %7 : vector<1x16x16xi32> to vector<16x16xi32>
    %cst = arith.constant dense<0xFF800000> : vector<16x16xf32>
    %9 = vector.multi_reduction <maximumf>, %6, %cst [0] : vector<19x16x16xf32> to vector<16x16xf32>
    %10 = vector.shape_cast %9 : vector<16x16xf32> to vector<1x16x16xf32>
    %11 = vector.broadcast %10 : vector<1x16x16xf32> to vector<19x16x16xf32>
    %12 = arith.subf %6, %11 : vector<19x16x16xf32>
    %13 = math.exp %12 : vector<19x16x16xf32>
    %cst_8 = arith.constant dense<0.000000e+00> : vector<16x16xf32>
    %14 = vector.multi_reduction <add>, %13, %cst_8 [0] : vector<19x16x16xf32> to vector<16x16xf32>
    %15 = math.log %14 : vector<16x16xf32>
    %16 = arith.addf %9, %15 : vector<16x16xf32>
    %17 = tpu.iota {dimensions = array<i32: 0>} : vector<19x1x1xi32>
    %18 = vector.shape_cast %8 : vector<16x16xi32> to vector<1x16x16xi32>
    %19 = vector.broadcast %17 : vector<19x1x1xi32> to vector<19x16x16xi32>
    %20 = vector.broadcast %18 : vector<1x16x16xi32> to vector<19x16x16xi32>
    %21 = arith.cmpi eq, %19, %20 : vector<19x16x16xi32>
    %cst_9 = arith.constant 0.000000e+00 : f32
    %22 = vector.broadcast %cst_9 : f32 to vector<19x16x16xf32>
    %23 = arith.select %21, %6, %22 : vector<19x16x16xi1>, vector<19x16x16xf32>
    %cst_10 = arith.constant dense<0.000000e+00> : vector<16x16xf32>
    %24 = vector.multi_reduction <add>, %23, %cst_10 [0] : vector<19x16x16xf32> to vector<16x16xf32>
    %c-1_i32 = arith.constant -1 : i32
    %25 = vector.broadcast %c-1_i32 : i32 to vector<16x16xi32>
    %26 = arith.cmpi ne, %8, %25 : vector<16x16xi32>
    %c0_11 = arith.constant 0 : index
    %c0_12 = arith.constant 0 : index
    %27 = vector.load %arg7[%c0_11, %c0_12] : memref<16x16xf32, #tpu.memory_space<vmem>>, vector<16x16xf32>
    %28 = arith.subf %16, %24 : vector<16x16xf32>
    %cst_13 = arith.constant 0.000000e+00 : f32
    %29 = vector.broadcast %cst_13 : f32 to vector<16x16xf32>
    %30 = arith.select %26, %28, %29 : vector<16x16xi1>, vector<16x16xf32>
    %31 = arith.addf %27, %30 : vector<16x16xf32>
    %c0_14 = arith.constant 0 : index
    %c0_15 = arith.constant 0 : index
    %32 = vector.load %arg7[%c0_14, %c0_15] : memref<16x16xf32, #tpu.memory_space<vmem>>, vector<16x16xf32>
    tpu.vector_store %arg7[%c0_14, %c0_15], %31 {strides = array<i32>} : memref<16x16xf32, #tpu.memory_space<vmem>>, vector<16x16xf32>,
    %c0_16 = arith.constant 0 : index
    %c0_17 = arith.constant 0 : index
    %33 = vector.load %arg8[%c0_16, %c0_17] : memref<16x16xf32, #tpu.memory_space<vmem>>, vector<16x16xf32>
    %34 = arith.extui %26 : vector<16x16xi1> to vector<16x16xi32>
    %35 = arith.sitofp %34 : vector<16x16xi32> to vector<16x16xf32>
    %36 = arith.addf %33, %35 : vector<16x16xf32>
    %c0_18 = arith.constant 0 : index
    %c0_19 = arith.constant 0 : index
    %37 = vector.load %arg8[%c0_18, %c0_19] : memref<16x16xf32, #tpu.memory_space<vmem>>, vector<16x16xf32>
    tpu.vector_store %arg8[%c0_18, %c0_19], %36 {strides = array<i32>} : memref<16x16xf32, #tpu.memory_space<vmem>>, vector<16x16xf32>,
    %c1_i32 = arith.constant 1 : i32
    %38 = arith.cmpi eq, %arg1, %c1_i32 : i32
    %c0_i32_20 = arith.constant 0 : i32
    %39 = arith.cmpi eq, %arg2, %c0_i32_20 : i32
    %40 = arith.andi %38, %39 : i1
    %41 = arith.extui %40 : i1 to i32
    %c0_i32_21 = arith.constant 0 : i32
    %42 = arith.cmpi ne, %41, %c0_i32_21 : i32
    scf.if %42 {
      %c0_22 = arith.constant 0 : index
      %c0_23 = arith.constant 0 : index
      %43 = vector.load %arg7[%c0_22, %c0_23] : memref<16x16xf32, #tpu.memory_space<vmem>>, vector<16x16xf32>
      %44 = vector.shape_cast %43 : vector<16x16xf32> to vector<1x16x16xf32>
      %cst_24 = arith.constant dense<0.000000e+00> : vector<1xf32>
      %45 = vector.multi_reduction <add>, %44, %cst_24 [1, 2] : vector<1x16x16xf32> to vector<1xf32>
      %46 = vector.shape_cast %45 : vector<1xf32> to vector<1x1x1xf32>
      %47 = vector.extract %46[0, 0, 0] : f32 from vector<1x1x1xf32>
      %48 = vector.broadcast %47 : f32 to vector<1x128xf32>
      %c0_25 = arith.constant 0 : index
      %c0_26 = arith.constant 0 : index
      %49 = vector.load %arg5[%c0_25, %c0_26] : memref<1x128xf32, #tpu.memory_space<vmem>>, vector<1x128xf32>
      tpu.vector_store %arg5[%c0_25, %c0_26], %48 {strides = array<i32>} : memref<1x128xf32, #tpu.memory_space<vmem>>, vector<1x128xf32>,
      %c0_27 = arith.constant 0 : index
      %c0_28 = arith.constant 0 : index
      %50 = vector.load %arg8[%c0_27, %c0_28] : memref<16x16xf32, #tpu.memory_space<vmem>>, vector<16x16xf32>
      %51 = vector.shape_cast %50 : vector<16x16xf32> to vector<1x16x16xf32>
      %cst_29 = arith.constant dense<0.000000e+00> : vector<1xf32>
      %52 = vector.multi_reduction <add>, %51, %cst_29 [1, 2] : vector<1x16x16xf32> to vector<1xf32>
      %53 = vector.shape_cast %52 : vector<1xf32> to vector<1x1x1xf32>
      %54 = vector.extract %53[0, 0, 0] : f32 from vector<1x1x1xf32>
      %55 = vector.broadcast %54 : f32 to vector<1x128xf32>
      %c0_30 = arith.constant 0 : index
      %c0_31 = arith.constant 0 : index
      %56 = vector.load %arg6[%c0_30, %c0_31] : memref<1x128xf32, #tpu.memory_space<vmem>>, vector<1x128xf32>
      tpu.vector_store %arg6[%c0_30, %c0_31], %55 {strides = array<i32>} : memref<1x128xf32, #tpu.memory_space<vmem>>, vector<1x128xf32>,
    } else {
    }
    return
  }
  func.func @transform_0(%arg0: i32, %arg1: i32, %arg2: i32) -> (i32, i32, i32, i32) {
    %c1_i32 = arith.constant 1 : i32
    %0 = arith.muli %arg0, %c1_i32 : i32
    %1 = arith.addi %0, %arg2 : i32
    %c0_i32 = arith.constant 0 : i32
    %2 = arith.minsi %1, %c0_i32 : i32
    %c0_i32_0 = arith.constant 0 : i32
    %c0_i32_1 = arith.constant 0 : i32
    %c0_i32_2 = arith.constant 0 : i32
    return %arg1, %c0_i32_0, %2, %c0_i32_1 : i32, i32, i32, i32
  }
  func.func @transform_1(%arg0: i32, %arg1: i32, %arg2: i32) -> (i32, i32, i32) {
    %c1_i32 = arith.constant 1 : i32
    %0 = arith.muli %arg0, %c1_i32 : i32
    %1 = arith.addi %0, %arg2 : i32
    %c0_i32 = arith.constant 0 : i32
    %2 = arith.minsi %1, %c0_i32 : i32
    %c0_i32_0 = arith.constant 0 : i32
    %c0_i32_1 = arith.constant 0 : i32
    return %arg1, %2, %c0_i32_0 : i32, i32, i32
  }
  func.func @transform_2(%arg0: i32, %arg1: i32, %arg2: i32) -> (i32, i32) {
    %c0_i32 = arith.constant 0 : i32
    %c0_i32_0 = arith.constant 0 : i32
    return %c0_i32, %arg0 : i32, i32
  }
  func.func @transform_3(%arg0: i32, %arg1: i32, %arg2: i32) -> (i32, i32) {
    %c0_i32 = arith.constant 0 : i32
    %c0_i32_0 = arith.constant 0 : i32
    return %c0_i32, %arg0 : i32, i32
  }
}

</mosaic_0001>

<bundles_post_ra>
// kernel: tpu_custom_call.1
= control target key start
LH: loop header
LB: loop body
LE: loop exit
PB: predicated region body
PF: predicated region fallthrough
CT: control target
= control target key end

     0   :  { %9 = vsyncpa [#allocation5], 0  ;;  %s1781_s0 = inlined_call_operand.vmem [shape: f32[2,19,16,16], index: 0, kind: input, shape index: {}]   ;;  %s1782_s1 = inlined_call_operand.vmem [shape: s32[2,16,16], index: 1, kind: input, shape index: {}]   ;;  %s1783_s2 = inlined_call_operand.hbm [shape: f32[1,128], index: 2, kind: output, shape index: {0}]   ;;  %s1784_s3 = inlined_call_operand.hbm [shape: f32[1,128], index: 3, kind: output, shape index: {1}]  }
   0x1   :  { %10 = vsyncpa [#allocation7], 0  ;;  %s1173_s12 = smov 0   ;;  %s1175_s13 = smov 0  }
   0x2   :  { %s1177_s14 = smov 0  }
   0x3 LB: > { %s920_s15 = sadd.s32 4294967295, %s1147_s14   ;;  %s31_s16 = sadd.s32 1, %s1143_s13  ;;  %s1147_s14 = sphi %s1177_s14, %s16_s14   ;;  %s1143_s13 = sphi %s1175_s13, %s1812_s13   ;;  %s1139_s12 = sphi %s1173_s12, %s1811_s12  }
   0x4   : > { %p33_p0 = scmp.ge.s32.totalorder %s31_s16, 2  ;;  %p923_p1 = scmp.ge.s32.totalorder %s1147_s14, 1 }
   0x5   : > { %p209_p2 = scmp.lt.s32.totalorder %s1147_s14, 3 }
   0x6   : > { %s1814_s16 = smov (%p33_p0, %s31_s16), 0 }
   0x7   : > { %p210_p3 = pnand %p923_p1, %p209_p2 }
   0x9   : > { %213 = sbr.rel (%p210_p3) target bundleno = 420 (0x1a4), region = 28 }
  0x10   : > { %p251_p4 = scmp.lt.s32.totalorder %s1139_s12, 1  ;;  %p279_p5 = scmp.eq.s32.totalorder %s1139_s12, 0 }
  0x11   : > { %vm285_vm0 = vcmask (%p279_p5), 130048   ;;  %v1149_v0 = vmov (%p279_p5), 0.0  }
  0x12   : > { %s252_s17 = scalar_select %p251_p4, %s1139_s12, 1 }
  0x13   : > { %284 = sbr.rel (!%p279_p5) target bundleno = 26 (0x1a), region = 32  ;;  %286 = vst.msk [vmem:[#allocation2] sm:$0xff] (%p279_p5), %vm285_vm0, %v1149_v0  ;;  %287 = vst.msk [vmem:[#allocation2 + $0x8] sm:$0xff] (%p279_p5), %vm285_vm0, %v1149_v0 }
  0x14   : > { %s940_s18 = smul.u32 304, %s252_s17  ;;  %s937_s19 = sshll.u32 %s252_s17, 4  ;;  %288 = vst.msk [vmem:[#allocation3] sm:$0xff] (%p279_p5), %vm285_vm0, %v1149_v0  ;;  %289 = vst.msk [vmem:[#allocation3 + $0x8] sm:$0xff] (%p279_p5), %vm285_vm0, %v1149_v0 }
  0x15   : > { %s1200_s22 = scalar_lea.vmem %s1782_s1, %s937_s19 }
  0x16   : > { %s1205_s25 = scalar_lea.vmem %s1781_s0, %s940_s18 }
  0x1a PF: > { %v1208_v1 = vld [vmem:[%s1205_s25] sm:$0xff]  ;;  %v1211_v2 = vld [vmem:[%s1205_s25 + $0x8] sm:$0xff]  ;;  %v1214_v3 = vld [vmem:[%s1205_s25 + $0x10] sm:$0xff]  ;;  %vm330_vm1 = vcmask 130048   ;;  %p771_p6 = scmp.eq.s32.totalorder %s1139_s12, 1 }
  0x1b   : > { %v1217_v4 = vld [vmem:[%s1205_s25 + $0x18] sm:$0xff]  ;;  %v1220_v5 = vld [vmem:[%s1205_s25 + $0x20] sm:$0xff]  ;;  %v1223_v6 = vld [vmem:[%s1205_s25 + $0x28] sm:$0xff]  ;;  %v331_v7 = vsel %vm330_vm1, %v1208_v1, -inf  ;;  %v332_v8 = vsel %vm330_vm1, %v1214_v3, -inf  ;;  %v368_v9 = vsel %vm330_vm1, %v1211_v2, -inf }
  0x1c   : > { %v1232_v10 = vld [vmem:[%s1205_s25 + $0x30] sm:$0xff]  ;;  %v1235_v11 = vld [vmem:[%s1205_s25 + $0x38] sm:$0xff]  ;;  %v1238_v12 = vld [vmem:[%s1205_s25 + $0x40] sm:$0xff]  ;;  %v333_v13 = vsel %vm330_vm1, %v1220_v5, -inf  ;;  %v369_v14 = vsel %vm330_vm1, %v1217_v4, -inf  ;;  %v370_v15 = vsel %vm330_vm1, %v1223_v6, -inf }
  0x1d   : > { %v1247_v16 = vld [vmem:[%s1205_s25 + $0x48] sm:$0xff]  ;;  %v1250_v17 = vld [vmem:[%s1205_s25 + $0x50] sm:$0xff]  ;;  %v1253_v18 = vld [vmem:[%s1205_s25 + $0x58] sm:$0xff]  ;;  %v334_v19 = vmax.f32 %v331_v7, %v333_v13  ;;  %v335_v20 = vsel %vm330_vm1, %v1232_v10, -inf  ;;  %v337_v21 = vsel %vm330_vm1, %v1238_v12, -inf  ;;  %v371_v22 = vmax.f32 %v368_v9, %v370_v15 }
  0x1e   : > { %v1260_v23 = vld [vmem:[%s1205_s25 + $0x60] sm:$0xff]  ;;  %v1263_v24 = vld [vmem:[%s1205_s25 + $0x70] sm:$0xff]  ;;  %v336_v25 = vmax.f32 %v332_v8, %v335_v20  ;;  %v339_v26 = vsel %vm330_vm1, %v1250_v17, -inf  ;;  %v372_v27 = vsel %vm330_vm1, %v1235_v11, -inf  ;;  %v374_v28 = vsel %vm330_vm1, %v1247_v16, -inf  ;;  %v1272_v29 = vld [vmem:[%s1205_s25 + $0x68] sm:$0xff] }
  0x1f   : > { %v1275_v30 = vld [vmem:[%s1205_s25 + $0x78] sm:$0xff]  ;;  %v1278_v31 = vld [vmem:[%s1205_s25 + $0x80] sm:$0xff]  ;;  %v338_v32 = vmax.f32 %v334_v19, %v337_v21  ;;  %v341_v33 = vsel %vm330_vm1, %v1260_v23, -inf  ;;  %v343_v34 = vsel %vm330_vm1, %v1263_v24, -inf  ;;  %v373_v35 = vmax.f32 %v369_v14, %v372_v27  ;;  %v1285_v36 = vld [vmem:[%s1205_s25 + $0x90] sm:$0xff] }
  0x20   : > { %v1288_v37 = vld [vmem:[%s1205_s25 + $0xa0] sm:$0xff]  ;;  %v340_v38 = vmax.f32 %v336_v25, %v339_v26  ;;  %v345_v39 = vsel %vm330_vm1, %v1278_v31, -inf  ;;  %v375_v40 = vmax.f32 %v371_v22, %v374_v28  ;;  %v376_v41 = vsel %vm330_vm1, %v1253_v18, -inf  ;;  %v1296_v42 = vld [vmem:[%s1205_s25 + $0x88] sm:$0xff]  ;;  %v1299_v43 = vld [vmem:[%s1205_s25 + $0xb0] sm:$0xff] }
  0x21   : > { %1792 = vst [vmem:[#allocation10_spill] sm:$0xff] %v1299_v43  ;;  %v342_v44 = vmax.f32 %v338_v32, %v341_v33  ;;  %v347_v45 = vsel %vm330_vm1, %v1285_v36, -inf  ;;  %v377_v46 = vmax.f32 %v373_v35, %v376_v41  ;;  %v1304_v47 = vld [vmem:[%s1205_s25 + $0xc0] sm:$0xff]  ;;  %v1307_v48 = vld [vmem:[%s1205_s25 + $0xd0] sm:$0xff]  ;;  %v349_v50 = vsel %vm330_vm1, %v1288_v37, -inf  ;;  %v1316_v53 = vld [vmem:[%s1205_s25 + $0x98] sm:$0xff] }
  0x22   : > { %1793 = vst [vmem:[#allocation11_spill] sm:$0xff] %v1304_v47  ;;  %1794 = vst [vmem:[#allocation12_spill] sm:$0xff] %v1307_v48  ;;  %v344_v49 = vmax.f32 %v340_v38, %v343_v34  ;;  %v378_v51 = vsel %vm330_vm1, %v1272_v29, -inf  ;;  %v380_v52 = vsel %vm330_vm1, %v1275_v30, -inf  ;;  %v1319_v54 = vld [vmem:[%s1205_s25 + $0xa8] sm:$0xff]  ;;  %v1322_v55 = vld [vmem:[%s1205_s25 + $0xe0] sm:$0xff] }
  0x23   : > { %1795 = vst [vmem:[#allocation13_spill] sm:$0xff] %v1316_v53  ;;  %1796 = vst [vmem:[#allocation14_spill] sm:$0xff] %v1319_v54  ;;  %v346_v56 = vmax.f32 %v342_v44, %v345_v39  ;;  %v351_v57 = vsel %vm330_vm1, %v1299_v43, -inf  ;;  %v379_v58 = vmax.f32 %v375_v40, %v378_v51  ;;  %v1327_v59 = vld [vmem:[%s1205_s25 + $0xf0] sm:$0xff]  ;;  %v1330_v60 = vld [vmem:[%s1205_s25 + $0x100] sm:$0xff]  ;;  %v353_v62 = vsel %vm330_vm1, %v1304_v47, -inf }
  0x24   : > { %v348_v61 = vmax.f32 %v344_v49, %v347_v45  ;;  %v381_v63 = vmax.f32 %v377_v46, %v380_v52  ;;  %v382_v0 = vsel %vm330_vm1, %v1296_v42, -inf  ;;  %v1337_v7 = vld [vmem:[%s1205_s25 + $0xb8] sm:$0xff]  ;;  %v1340_v8 = vld [vmem:[%s1205_s25 + $0xc8] sm:$0xff]  ;;  %v355_v14 = vsel %vm330_vm1, %v1307_v48, -inf  ;;  %v1365_v32 = vld [vmem:[%s1205_s25 + $0x110] sm:$0xff] }
  0x25   : > { %1797 = vst [vmem:[#allocation15_spill] sm:$0xff] %v1337_v7  ;;  %1798 = vst [vmem:[#allocation16_spill] sm:$0xff] %v1340_v8  ;;  %v1343_v9 = vld [vmem:[%s1205_s25 + $0xd8] sm:$0xff]  ;;  %v350_v13 = vmax.f32 %v346_v56, %v349_v50  ;;  %v357_v15 = vsel %vm330_vm1, %v1322_v55, -inf  ;;  %v383_v19 = vmax.f32 %v379_v58, %v382_v0  ;;  %v1350_v20 = vld [vmem:[%s1205_s25 + $0xe8] sm:$0xff]  ;;  %v359_v22 = vsel %vm330_vm1, %v1327_v59, -inf }
  0x26   : > { %v352_v21 = vmax.f32 %v348_v61, %v351_v57  ;;  %v384_v25 = vsel %vm330_vm1, %v1316_v53, -inf  ;;  %v386_v26 = vsel %vm330_vm1, %v1319_v54, -inf  ;;  %v1359_v27 = vld [vmem:[%s1205_s25 + $0xf8] sm:$0xff]  ;;  %v1362_v28 = vld [vmem:[%s1205_s25 + $0x108] sm:$0xff]  ;;  %v361_v34 = vsel %vm330_vm1, %v1330_v60, -inf  ;;  %v1370_v39 = vld [vmem:[%s1205_s25 + $0x120] sm:$0xff] }
  0x27   : > { %v354_v33 = vmax.f32 %v350_v13, %v353_v62  ;;  %v385_v35 = vmax.f32 %v381_v63, %v384_v25  ;;  %v387_v38 = vmax.f32 %v383_v19, %v386_v26  ;;  %v388_v41 = vsel %vm330_vm1, %v1337_v7, -inf  ;;  %v1379_v46 = vld [vmem:[%s1205_s25 + $0x118] sm:$0xff]  ;;  %v1382_v49 = vld [vmem:[%s1205_s25 + $0x128] sm:$0xff] }
  0x28   : > { %v356_v40 = vmax.f32 %v352_v21, %v355_v14  ;;  %v390_v44 = vsel %vm330_vm1, %v1340_v8, -inf  ;;  %v392_v45 = vsel %vm330_vm1, %v1343_v9, -inf  ;;  %v394_v56 = vsel %vm330_vm1, %v1350_v20, -inf }
  0x29   : > { %v358_v50 = vmax.f32 %v354_v33, %v357_v15  ;;  %v389_v51 = vmax.f32 %v385_v35, %v388_v41  ;;  %v391_v52 = vmax.f32 %v387_v38, %v390_v44  ;;  %v363_v58 = vsel %vm330_vm1, %v1365_v32, -inf }
  0x2a   : > { %v360_v57 = vmax.f32 %v356_v40, %v359_v22  ;;  %v396_v61 = vsel %vm330_vm1, %v1359_v27, -inf  ;;  %v398_v62 = vsel %vm330_vm1, %v1362_v28, -inf  ;;  %v365_v0 = vsel %vm330_vm1, %v1370_v39, -inf }
  0x2b   : > { %v362_v63 = vmax.f32 %v358_v50, %v361_v34  ;;  %v393_v13 = vmax.f32 %v389_v51, %v392_v45  ;;  %v395_v14 = vmax.f32 %v391_v52, %v394_v56  ;;  %v400_v15 = vsel %vm330_vm1, %v1379_v46, -inf }
  0x2c   : > { %v402_v19 = vsel %vm330_vm1, %v1382_v49, -inf  ;;  %v364_v25 = vmax.f32 %v360_v57, %v363_v58 }
  0x2d   : > { %v397_v21 = vmax.f32 %v393_v13, %v396_v61  ;;  %v399_v22 = vmax.f32 %v395_v14, %v398_v62  ;;  %v366_v26 = vmax.f32 %v362_v63, %v365_v0 }
  0x2f   : > { %v401_v33 = vmax.f32 %v397_v21, %v400_v15  ;;  %v403_v35 = vmax.f32 %v399_v22, %v402_v19  ;;  %v1398_v38 = vmax.f32 %v366_v26, %v364_v25 }
  0x31   : > { %v1400_v34 = vmax.f32 %v403_v35, %v401_v33  ;;  %v405_v40 = vsub.f32 %v1208_v1, %v1398_v38  ;;  %v407_v44 = vsub.f32 %v1214_v3, %v1398_v38  ;;  %v409_v50 = vsub.f32 %v1220_v5, %v1398_v38 }
  0x32   : > { %v411_v52 = vsub.f32 %v1232_v10, %v1398_v38  ;;  %v413_v63 = vsub.f32 %v1238_v12, %v1398_v38  ;;  %v415_v15 = vsub.f32 %v1250_v17, %v1398_v38  ;;  %v417_v25 = vsub.f32 %v1260_v23, %v1398_v38 }
  0x33   : > { %v406_v41 = vsub.f32 %v1211_v2, %v1400_v34  ;;  %v408_v45 = vsub.f32 %v1217_v4, %v1400_v34  ;;  %v410_v51 = vsub.f32 %v1223_v6, %v1400_v34  ;;  %v443_v56 = vmul.f32 1.442695, %v405_v40 }
  0x34   : > { %v412_v57 = vsub.f32 %v1235_v11, %v1400_v34  ;;  %v447_v61 = vmul.f32 1.442695, %v407_v44  ;;  %v451_v0 = vmul.f32 1.442695, %v409_v50  ;;  %v414_v13 = vsub.f32 %v1247_v16, %v1400_v34 }
  0x35   : > { %v445_v58 = vmul.f32 1.442695, %v406_v41  ;;  %v449_v62 = vmul.f32 1.442695, %v408_v45  ;;  %985 = vpow2.f32 %v443_v56  ;;  %v453_v14 = vmul.f32 1.442695, %v410_v51 }
  0x36   : > { %v455_v19 = vmul.f32 1.442695, %v411_v52  ;;  %v416_v21 = vsub.f32 %v1253_v18, %v1400_v34  ;;  %v457_v22 = vmul.f32 1.442695, %v412_v57  ;;  %v459_v26 = vmul.f32 1.442695, %v413_v63 }
  0x37   : > { %987 = vpow2.f32 %v445_v58  ;;  %v418_v33 = vsub.f32 %v1272_v29, %v1400_v34  ;;  %v461_v35 = vmul.f32 1.442695, %v414_v13  ;;  %v419_v40 = vsub.f32 %v1263_v24, %v1398_v38 }
  0x38   : > { %989 = vpow2.f32 %v447_v61  ;;  %v420_v41 = vsub.f32 %v1275_v30, %v1400_v34  ;;  %v463_v44 = vmul.f32 1.442695, %v415_v15  ;;  %v421_v45 = vsub.f32 %v1278_v31, %v1398_v38 }
  0x39   : > { %991 = vpow2.f32 %v449_v62  ;;  %v422_v50 = vsub.f32 %v1296_v42, %v1400_v34  ;;  %v465_v51 = vmul.f32 1.442695, %v416_v21  ;;  %v423_v52 = vsub.f32 %v1285_v36, %v1398_v38 }
  0x3a   : > { %993 = vpow2.f32 %v451_v0  ;;  %v424_v56 = vsub.f32 %v1316_v53, %v1400_v34  ;;  %v467_v57 = vmul.f32 1.442695, %v417_v25  ;;  %v425_v58 = vsub.f32 %v1288_v37, %v1398_v38 }
  0x3b   : > { %995 = vpow2.f32 %v453_v14  ;;  %v426_v61 = vsub.f32 %v1319_v54, %v1400_v34  ;;  %v469_v62 = vmul.f32 1.442695, %v418_v33  ;;  %v427_v0 = vsub.f32 %v1299_v43, %v1398_v38 }
  0x3c   : > { %997 = vpow2.f32 %v455_v19  ;;  %v428_v13 = vsub.f32 %v1337_v7, %v1400_v34  ;;  %v471_v14 = vmul.f32 1.442695, %v419_v40  ;;  %v429_v19 = vsub.f32 %v1304_v47, %v1398_v38 }
  0x3d   : > { %999 = vpow2.f32 %v457_v22  ;;  %v473_v21 = vmul.f32 1.442695, %v420_v41  ;;  %v475_v33 = vmul.f32 1.442695, %v421_v45  ;;  %v431_v40 = vsub.f32 %v1307_v48, %v1398_v38 }
  0x3e   : > { %1001 = vpow2.f32 %v459_v26  ;;  %v430_v26 = vsub.f32 %v1340_v8, %v1400_v34  ;;  %v479_v41 = vmul.f32 1.442695, %v423_v52  ;;  %v483_v43 = vmul.f32 1.442695, %v425_v58 }
  0x3f   : > { %1003 = vpow2.f32 %v461_v35  ;;  %v986_v63 = vpop.eup %985 }
  0x40   : > { %1005 = vpow2.f32 %v463_v44  ;;  %v519_v22 = vsel %vm330_vm1, %v986_v63, 0.0  ;;  %v477_v44 = vmul.f32 1.442695, %v422_v50 }
  0x41   : > { %v988_v15 = vpop.eup %987  ;;  %1007 = vpow2.f32 %v465_v51 }
  0x42   : > { %v990_v25 = vpop.eup %989  ;;  %1009 = vpow2.f32 %v467_v57  ;;  %v556_v35 = vsel %vm330_vm1, %v988_v15, 0.0  ;;  %v481_v57 = vmul.f32 1.442695, %v424_v56 }
  0x43   : > { %v992_v54 = vpop.eup %991  ;;  %1011 = vpow2.f32 %v469_v62  ;;  %v520_v7 = vsel %vm330_vm1, %v990_v25, 0.0  ;;  %v485_v25 = vmul.f32 1.442695, %v426_v61 }
  0x44   : > { %v994_v51 = vpop.eup %993  ;;  %1013 = vpow2.f32 %v471_v14  ;;  %v521_v63 = vadd.f32 %v520_v7, %v519_v22  ;;  %v557_v47 = vsel %vm330_vm1, %v992_v54, 0.0  ;;  %v487_v54 = vmul.f32 1.442695, %v427_v0 }
  0x45   : > { %v996_v53 = vpop.eup %995  ;;  %1015 = vpow2.f32 %v473_v21  ;;  %v522_v45 = vsel %vm330_vm1, %v994_v51, 0.0  ;;  %v558_v15 = vadd.f32 %v557_v47, %v556_v35  ;;  %v489_v47 = vmul.f32 1.442695, %v428_v13 }
  0x46   : > { %v998_v8 = vpop.eup %997  ;;  %1017 = vpow2.f32 %v475_v33  ;;  %v523_v48 = vadd.f32 %v522_v45, %v521_v63  ;;  %v559_v50 = vsel %vm330_vm1, %v996_v53, 0.0  ;;  %v491_v53 = vmul.f32 1.442695, %v429_v19 }
  0x47   : > { %v1000_v62 = vpop.eup %999  ;;  %1019 = vpow2.f32 %v477_v44  ;;  %v524_v52 = vsel %vm330_vm1, %v998_v8, 0.0  ;;  %v560_v7 = vadd.f32 %v559_v50, %v558_v15  ;;  %v432_v51 = vsub.f32 %v1343_v9, %v1400_v34 }
  0x48   : > { %v1002_v14 = vpop.eup %1001  ;;  %1021 = vpow2.f32 %v479_v41  ;;  %v525_v21 = vadd.f32 %v524_v52, %v523_v48  ;;  %v561_v56 = vsel %vm330_vm1, %v1000_v62, 0.0  ;;  %v433_v13 = vsub.f32 %v1322_v55, %v1398_v38 }
  0x49   : > { %v1004_v22 = vpop.eup %1003  ;;  %1023 = vpow2.f32 %v481_v57  ;;  %v526_v58 = vsel %vm330_vm1, %v1002_v14, 0.0  ;;  %v562_v33 = vadd.f32 %v561_v56, %v560_v7  ;;  %v493_v57 = vmul.f32 1.442695, %v430_v26 }
  0x4a   : > { %v1006_v35 = vpop.eup %1005  ;;  %1025 = vpow2.f32 %v483_v43  ;;  %v527_v44 = vadd.f32 %v526_v58, %v525_v21  ;;  %v563_v61 = vsel %vm330_vm1, %v1004_v22, 0.0  ;;  %v495_v62 = vmul.f32 1.442695, %v431_v40 }
  0x4b   : > { %v1008_v8 = vpop.eup %1007  ;;  %1027 = vpow2.f32 %v485_v25  ;;  %v528_v48 = vsel %vm330_vm1, %v1006_v35, 0.0  ;;  %v564_v0 = vadd.f32 %v563_v61, %v562_v33  ;;  %v434_v56 = vsub.f32 %v1350_v20, %v1400_v34 }
  0x4c   : > { %v1010_v41 = vpop.eup %1009  ;;  %1029 = vpow2.f32 %v487_v54  ;;  %v529_v63 = vadd.f32 %v528_v48, %v527_v44  ;;  %v565_v43 = vsel %vm330_vm1, %v1008_v8, 0.0  ;;  %v435_v26 = vsub.f32 %v1327_v59, %v1398_v38 }
  0x4d   : > { %v1012_v19 = vpop.eup %1011  ;;  %1031 = vpow2.f32 %v489_v47  ;;  %v530_v45 = vsel %vm330_vm1, %v1010_v41, 0.0  ;;  %v566_v15 = vadd.f32 %v565_v43, %v564_v0  ;;  %v497_v40 = vmul.f32 1.442695, %v432_v51 }
  0x4e   : > { %v1014_v50 = vpop.eup %1013  ;;  %1033 = vpow2.f32 %v491_v53  ;;  %v531_v25 = vadd.f32 %v530_v45, %v529_v63  ;;  %v567_v52 = vsel %vm330_vm1, %v1012_v19, 0.0  ;;  %v499_v44 = vmul.f32 1.442695, %v433_v13 }
  0x4f   : > { %v1016_v7 = vpop.eup %1015  ;;  %v532_v14 = vsel %vm330_vm1, %v1014_v50, 0.0  ;;  %v568_v21 = vadd.f32 %v567_v52, %v566_v15  ;;  %1035 = vpow2.f32 %v493_v57  ;;  %v436_v43 = vsub.f32 %v1359_v27, %v1400_v34 }
  0x50   : > { %v1018_v54 = vpop.eup %1017  ;;  %v533_v22 = vadd.f32 %v532_v14, %v531_v25  ;;  %v569_v47 = vsel %vm330_vm1, %v1016_v7, 0.0  ;;  %1037 = vpow2.f32 %v495_v62  ;;  %v437_v51 = vsub.f32 %v1330_v60, %v1398_v38 }
  0x51   : > { %v1020_v58 = vpop.eup %1019  ;;  %v534_v33 = vsel %vm330_vm1, %v1018_v54, 0.0  ;;  %v570_v35 = vadd.f32 %v569_v47, %v568_v21  ;;  %1039 = vpow2.f32 %v497_v40  ;;  %v501_v13 = vmul.f32 1.442695, %v434_v56 }
  0x52   : > { %v1022_v53 = vpop.eup %1021  ;;  %v535_v61 = vadd.f32 %v534_v33, %v533_v22  ;;  %v571_v8 = vsel %vm330_vm1, %v1020_v58, 0.0  ;;  %1041 = vpow2.f32 %v499_v44  ;;  %v503_v25 = vmul.f32 1.442695, %v435_v26 }
  0x53   : > { %v1024_v48 = vpop.eup %1023  ;;  %v536_v0 = vsel %vm330_vm1, %v1022_v53, 0.0  ;;  %v572_v41 = vadd.f32 %v571_v8, %v570_v35  ;;  %v438_v22 = vsub.f32 %v1362_v28, %v1400_v34  ;;  %v439_v56 = vsub.f32 %v1365_v32, %v1398_v38  ;;  %v1500_v8 = vld [vmem:[%s1200_s22] sm:$0xff] }
  0x54   : > { %v1026_v63 = vpop.eup %1025  ;;  %v537_v19 = vadd.f32 %v536_v0, %v535_v61  ;;  %v573_v57 = vsel %vm330_vm1, %v1024_v48, 0.0  ;;  %1043 = vpow2.f32 %v501_v13  ;;  %v505_v47 = vmul.f32 1.442695, %v436_v43  ;;  %v1503_v48 = vld [vmem:[%s1200_s22 + $0x8] sm:$0xff] }
  0x55   : > { %v1028_v45 = vpop.eup %1027  ;;  %v538_v15 = vsel %vm330_vm1, %v1026_v63, 0.0  ;;  %v574_v50 = vadd.f32 %v573_v57, %v572_v41  ;;  %1045 = vpow2.f32 %v503_v25  ;;  %v507_v26 = vmul.f32 1.442695, %v437_v51 }
  0x56   : > { %v1030_v62 = vpop.eup %1029  ;;  %v539_v52 = vadd.f32 %v538_v15, %v537_v19  ;;  %v575_v7 = vsel %vm330_vm1, %v1028_v45, 0.0  ;;  %v440_v61 = vsub.f32 %v1379_v46, %v1400_v34  ;;  %v441_v0 = vsub.f32 %v1370_v39, %v1398_v38 }
  0x57   : > { %v1032_v14 = vpop.eup %1031  ;;  %v540_v21 = vsel %vm330_vm1, %v1030_v62, 0.0  ;;  %v576_v58 = vadd.f32 %v575_v7, %v574_v50  ;;  %1047 = vpow2.f32 %v505_v47  ;;  %v509_v41 = vmul.f32 1.442695, %v438_v22 }
  0x58   : > { %v1034_v54 = vpop.eup %1033  ;;  %v541_v40 = vadd.f32 %v540_v21, %v539_v52  ;;  %v577_v33 = vsel %vm330_vm1, %v1032_v14, 0.0  ;;  %1049 = vpow2.f32 %v507_v26  ;;  %v511_v43 = vmul.f32 1.442695, %v439_v56 }
  0x59   : > { %v1036_v35 = vpop.eup %1035  ;;  %v542_v53 = vsel %vm330_vm1, %v1034_v54, 0.0  ;;  %v578_v63 = vadd.f32 %v577_v33, %v576_v58  ;;  %vm599_vm2 = vcmp.eq.s32.totalorder %v1500_v8, 0  ;;  %vm600_vm3 = vcmp.eq.s32.totalorder %v1503_v48, 0 }
  0x5a   : > { %v1038_v44 = vpop.eup %1037  ;;  %v543_v51 = vadd.f32 %v542_v53, %v541_v40  ;;  %v579_v19 = vsel %vm330_vm1, %v1036_v35, 0.0  ;;  %vm601_vm4 = vcmp.eq.s32.totalorder %v1500_v8, 1  ;;  %vm602_vm5 = vcmp.eq.s32.totalorder %v1503_v48, 1 }
  0x5b   : > { %v1040_v57 = vpop.eup %1039  ;;  %v544_v45 = vsel %vm330_vm1, %v1038_v44, 0.0  ;;  %v442_v15 = vsub.f32 %v1382_v49, %v1400_v34  ;;  %1051 = vpow2.f32 %v509_v41  ;;  %v513_v50 = vmul.f32 1.442695, %v440_v61 }
  0x5c   : > { %v1042_v13 = vpop.eup %1041  ;;  %v580_v62 = vadd.f32 %v579_v19, %v578_v63  ;;  %1053 = vpow2.f32 %v511_v43  ;;  %v515_v25 = vmul.f32 1.442695, %v441_v0  ;;  %v545_v52 = vadd.f32 %v544_v45, %v543_v51 }
  0x5d   : > { %v581_v7 = vsel %vm330_vm1, %v1040_v57, 0.0  ;;  %v546_v21 = vsel %vm330_vm1, %v1042_v13, 0.0  ;;  %vm603_vm6 = vcmp.eq.s32.totalorder %v1500_v8, 2  ;;  %vm604_vm7 = vcmp.eq.s32.totalorder %v1503_v48, 2 }
  0x5e   : > { %v1044_v14 = vpop.eup %1043  ;;  %vm605_vm8 = vcmp.eq.s32.totalorder %v1500_v8, 3  ;;  %vm606_vm9 = vcmp.eq.s32.totalorder %v1503_v48, 3  ;;  %vm607_vm10 = vcmp.eq.s32.totalorder %v1500_v8, 4  ;;  %vm608_vm11 = vcmp.eq.s32.totalorder %v1503_v48, 4 }
  0x5f   : > { %v1046_v54 = vpop.eup %1045  ;;  %1055 = vpow2.f32 %v513_v50  ;;  %v517_v22 = vmul.f32 1.442695, %v442_v15  ;;  %v582_v56 = vadd.f32 %v581_v7, %v580_v62  ;;  %v547_v47 = vadd.f32 %v546_v21, %v545_v52 }
  0x60   : > { %1057 = vpow2.f32 %v515_v25  ;;  %v583_v58 = vsel %vm330_vm1, %v1044_v14, 0.0  ;;  %vm611_vm14 = vcmp.eq.s32.totalorder %v1500_v8, 6  ;;  %v548_v40 = vsel %vm330_vm1, %v1046_v54, 0.0 }
  0x61   : > { %v1048_v26 = vpop.eup %1047  ;;  %v637_v33 = vsel %vm599_vm2, %v1208_v1, 0.0  ;;  %vm614_vm13 = vcmp.eq.s32.totalorder %v1503_v48, 7  ;;  %vm615_vm12 = vcmp.eq.s32.totalorder %v1500_v8, 8  ;;  %v639_v53 = vsel %vm601_vm4, %v1214_v3, 0.0 }
  0x62   : > { %v1050_v35 = vpop.eup %1049  ;;  %v641_v44 = vsel %vm603_vm6, %v1220_v5, 0.0  ;;  %1059 = vpow2.f32 %v517_v22  ;;  %v584_v61 = vadd.f32 %v583_v58, %v582_v56  ;;  %vm616_vm0 = vcmp.eq.s32.totalorder %v1503_v48, 8 }
  0x63   : > { %vm617_vm15 = vcmp.eq.s32.totalorder %v1500_v8, 9  ;;  %v638_v1 = vsel %vm600_vm3, %v1211_v2, 0.0  ;;  %v640_v0 = vsel %vm602_vm5, %v1217_v4, 0.0  ;;  %v549_v41 = vadd.f32 %v548_v40, %v547_v47 }
  0x64   : > { %v585_v3 = vsel %vm330_vm1, %v1048_v26, 0.0  ;;  %vm619_vm2 = vcmp.eq.s32.totalorder %v1500_v8, 10  ;;  %v643_v5 = vsel %vm605_vm8, %v1232_v10, 0.0  ;;  %v675_v63 = vsel %vm330_vm1, %v637_v33, 0.0 }
  0x65   : > { %v1052_v43 = vpop.eup %1051  ;;  %v550_v51 = vsel %vm330_vm1, %v1050_v35, 0.0  ;;  %vm621_vm3 = vcmp.eq.s32.totalorder %v1500_v8, 11  ;;  %v642_v2 = vsel %vm604_vm7, %v1223_v6, 0.0  ;;  %v676_v4 = vsel %vm330_vm1, %v639_v53, 0.0 }
  0x66   : > { %v678_v19 = vsel %vm330_vm1, %v641_v44, 0.0  ;;  %v1054_v57 = vpop.eup %1053  ;;  %v644_v10 = vsel %vm606_vm9, %v1235_v11, 0.0  ;;  %v645_v45 = vsel %vm607_vm10, %v1238_v12, 0.0  ;;  %v646_v13 = vsel %vm608_vm11, %v1247_v16, 0.0 }
  0x67   : > { %v677_v15 = vadd.f32 %v676_v4, %v675_v63  ;;  %v586_v50 = vadd.f32 %v585_v3, %v584_v61  ;;  %vm1799_vm4 = vcmp.eq.s32.totalorder %v1500_v8, 5  ;;  %vm1800_vm5 = vcmp.eq.s32.totalorder %v1503_v48, 5 }
  0x68   : > { %v647_v6 = vsel %vm1799_vm4, %v1250_v17, 0.0  ;;  %v648_v62 = vsel %vm1800_vm5, %v1253_v18, 0.0  ;;  %v680_v11 = vsel %vm330_vm1, %v643_v5, 0.0  ;;  %v551_v25 = vadd.f32 %v550_v51, %v549_v41 }
  0x69   : > { %v587_v52 = vsel %vm330_vm1, %v1052_v43, 0.0  ;;  %v649_v12 = vsel %vm611_vm14, %v1260_v23, 0.0  ;;  %v679_v16 = vadd.f32 %v678_v19, %v677_v15  ;;  %v1056_v7 = vpop.eup %1055  ;;  %v552_v14 = vsel %vm330_vm1, %v1054_v57, 0.0  ;;  %v1803_v19 = vld [vmem:[#allocation10_spill] sm:$0xff]  ;;  %v762_v15 = vld [vmem:[#allocation3 + $0x8] sm:$0xff] }
  0x6a   : > { %vm1801_vm6 = vcmp.eq.s32.totalorder %v1503_v48, 6  ;;  %vm1802_vm7 = vcmp.eq.s32.totalorder %v1500_v8, 7  ;;  %v682_v21 = vsel %vm330_vm1, %v645_v45, 0.0  ;;  %v1058_v54 = vpop.eup %1057  ;;  %vm618_vm8 = vcmp.eq.s32.totalorder %v1503_v48, 9 }
  0x6b   : > { %v650_v17 = vsel %vm1801_vm6, %v1272_v29, 0.0  ;;  %v651_v18 = vsel %vm1802_vm7, %v1263_v24, 0.0  ;;  %v681_v22 = vadd.f32 %v680_v11, %v679_v16  ;;  %v712_v23 = vsel %vm330_vm1, %v638_v1, 0.0 }
  0x6c   : > { %v713_v56 = vsel %vm330_vm1, %v640_v0, 0.0  ;;  %v715_v47 = vsel %vm330_vm1, %v642_v2, 0.0  ;;  %v588_v58 = vadd.f32 %v587_v52, %v586_v50  ;;  %vm623_vm9 = vcmp.eq.s32.totalorder %v1500_v8, 12  ;;  %v1060_v44 = vpop.eup %1059 }
  0x6d   : > { %v652_v29 = vsel %vm614_vm13, %v1275_v30, 0.0  ;;  %v684_v24 = vsel %vm330_vm1, %v647_v6, 0.0  ;;  %v714_v26 = vadd.f32 %v713_v56, %v712_v23  ;;  %v553_v40 = vadd.f32 %v552_v14, %v551_v25  ;;  %v1805_v56 = vld [vmem:[#allocation11_spill] sm:$0xff] }
  0x6e   : > { %v589_v33 = vsel %vm330_vm1, %v1056_v7, 0.0  ;;  %vm620_vm10 = vcmp.eq.s32.totalorder %v1503_v48, 10  ;;  %v683_v35 = vadd.f32 %v682_v21, %v681_v22  ;;  %v717_v53 = vsel %vm330_vm1, %v644_v10, 0.0  ;;  %v1804_v21 = vld [vmem:[#allocation13_spill] sm:$0xff] }
  0x6f   : > { %v554_v61 = vsel %vm330_vm1, %v1058_v54, 0.0  ;;  %vm625_vm11 = vcmp.eq.s32.totalorder %v1500_v8, 13  ;;  %v653_v30 = vsel %vm615_vm12, %v1278_v31, 0.0  ;;  %v686_v1 = vsel %vm330_vm1, %v649_v12, 0.0 }
  0x70   : > { %v716_v0 = vadd.f32 %v715_v47, %v714_v26  ;;  %vm622_vm13 = vcmp.eq.s32.totalorder %v1503_v48, 11  ;;  %v654_v41 = vsel %vm616_vm0, %v1296_v42, 0.0  ;;  %v655_v3 = vsel %vm617_vm15, %v1285_v36, 0.0 }
  0x71   : > { %v685_v5 = vadd.f32 %v684_v24, %v683_v35  ;;  %v719_v63 = vsel %vm330_vm1, %v646_v13, 0.0  ;;  %v590_v43 = vadd.f32 %v589_v33, %v588_v58  ;;  %v657_v31 = vsel %vm619_vm2, %v1288_v37, 0.0  ;;  %v761_v37 = vld [vmem:[#allocation3] sm:$0xff] }
  0x72   : > { %v688_v51 = vsel %vm330_vm1, %v651_v18, 0.0  ;;  %v718_v2 = vadd.f32 %v717_v53, %v716_v0  ;;  %v555_v4 = vadd.f32 %v554_v61, %v553_v40  ;;  %vm624_vm12 = vcmp.eq.s32.totalorder %v1503_v48, 12  ;;  %v1807_v35 = vld [vmem:[#allocation12_spill] sm:$0xff] }
  0x73   : > { %v659_v42 = vsel %vm621_vm3, %v1803_v19, 0.0  ;;  %v687_v57 = vadd.f32 %v686_v1, %v685_v5  ;;  %v721_v36 = vsel %vm330_vm1, %v648_v62, 0.0  ;;  %v591_v10 = vsel %vm330_vm1, %v1060_v44, 0.0 }
  0x74   : > { %v690_v45 = vsel %vm330_vm1, %v653_v30, 0.0  ;;  %v720_v13 = vadd.f32 %v719_v63, %v718_v2  ;;  %vm749_vm14 = vcmp.ne.s32.totalorder %v1500_v8, 4294967295  ;;  %v723_v6 = vsel %vm330_vm1, %v650_v17, 0.0  ;;  %v1808_v30 = vld [vmem:[#allocation15_spill] sm:$0xff] }
  0x75   : > { %v689_v50 = vadd.f32 %v688_v51, %v687_v57  ;;  %vm750_vm15 = vcmp.ne.s32.totalorder %v1503_v48, 4294967295  ;;  %v692_v11 = vsel %vm330_vm1, %v655_v3, 0.0  ;;  %v1150_v52 = vmov 0.0  }
  0x76   : > { %v722_v25 = vadd.f32 %v721_v36, %v720_v13  ;;  %v928_v62 = vsel %vm749_vm14, 1.0, %v1150_v52  ;;  %v929_v12 = vsel %vm750_vm15, 1.0, %v1150_v52  ;;  %v725_v7 = vsel %vm330_vm1, %v652_v29, 0.0  ;;  %v1806_v29 = vld [vmem:[#allocation14_spill] sm:$0xff] }
  0x77   : > { %v691_v16 = vadd.f32 %v690_v45, %v689_v50  ;;  %v767_v14 = vadd.f32 %v928_v62, %v761_v37  ;;  %v768_v18 = vadd.f32 %v929_v12, %v762_v15  ;;  %1061 = vlog2.f32 %v555_v4 }
  0x78   : > { %v656_v17 = vsel %vm618_vm8, %v1804_v21, 0.0  ;;  %v694_v54 = vsel %vm330_vm1, %v657_v31, 0.0  ;;  %v724_v22 = vadd.f32 %v723_v6, %v722_v25  ;;  %v592_v23 = vadd.f32 %v591_v10, %v590_v43  ;;  %v1809_v43 = vld [vmem:[#allocation16_spill] sm:$0xff] }
  0x79   : > { %v661_v47 = vsel %vm623_vm9, %v1805_v56, 0.0  ;;  %v693_v58 = vadd.f32 %v692_v11, %v691_v16  ;;  %v727_v24 = vsel %vm330_vm1, %v654_v41, 0.0  ;;  %769 = vst.msk [vmem:[#allocation3] sm:$0xff] %vm330_vm1, %v767_v14  ;;  %770 = vst.msk [vmem:[#allocation3 + $0x8] sm:$0xff] %vm330_vm1, %v768_v18  ;;  %vm627_vm0 = vcmp.eq.s32.totalorder %v1500_v8, 14 }
  0x7a   : > { %v658_v26 = vsel %vm620_vm10, %v1806_v29, 0.0  ;;  %v696_v40 = vsel %vm330_vm1, %v659_v42, 0.0  ;;  %v726_v33 = vadd.f32 %v725_v7, %v724_v22  ;;  %vm626_vm2 = vcmp.eq.s32.totalorder %v1503_v48, 13 }
  0x7b   : > { %v663_v53 = vsel %vm625_vm11, %v1807_v35, 0.0  ;;  %v695_v44 = vadd.f32 %v694_v54, %v693_v58  ;;  %v729_v61 = vsel %vm330_vm1, %v656_v17, 0.0  ;;  %vm629_vm3 = vcmp.eq.s32.totalorder %v1500_v8, 15 }
  0x7c   : > { %v660_v1 = vsel %vm622_vm13, %v1808_v30, 0.0  ;;  %v698_v0 = vsel %vm330_vm1, %v661_v47, 0.0  ;;  %v728_v41 = vadd.f32 %v727_v24, %v726_v33  ;;  %1063 = vlog2.f32 %v592_v23  ;;  %v751_v33 = vld [vmem:[#allocation2] sm:$0xff]  ;;  %v752_v30 = vld [vmem:[#allocation2 + $0x8] sm:$0xff] }
  0x7d   : > { %v665_v3 = vsel %vm627_vm0, %v1322_v55, 0.0  ;;  %v697_v5 = vadd.f32 %v696_v40, %v695_v44  ;;  %v731_v63 = vsel %vm330_vm1, %v658_v26, 0.0  ;;  %vm631_vm4 = vcmp.eq.s32.totalorder %v1500_v8, 16 }
  0x7e   : > { %v662_v31 = vsel %vm624_vm12, %v1809_v43, 0.0  ;;  %v700_v51 = vsel %vm330_vm1, %v663_v53, 0.0  ;;  %v730_v2 = vadd.f32 %v729_v61, %v728_v41  ;;  %vm628_vm5 = vcmp.eq.s32.totalorder %v1503_v48, 14 }
  0x7f   : > { %v667_v4 = vsel %vm629_vm3, %v1327_v59, 0.0  ;;  %v699_v19 = vadd.f32 %v698_v0, %v697_v5  ;;  %v733_v42 = vsel %vm330_vm1, %v660_v1, 0.0  ;;  %vm633_vm6 = vcmp.eq.s32.totalorder %v1500_v8, 17 }
  0x80   : > { %v664_v55 = vsel %vm626_vm2, %v1343_v9, 0.0  ;;  %v702_v57 = vsel %vm330_vm1, %v665_v3, 0.0  ;;  %v732_v36 = vadd.f32 %v731_v63, %v730_v2  ;;  %vm630_vm7 = vcmp.eq.s32.totalorder %v1503_v48, 15  ;;  %v792_v3 = vld [vmem:[#allocation3] sm:$0xff] (%p771_p6)  ;;  %v793_v63 = vld [vmem:[#allocation3 + $0x8] sm:$0xff] (%p771_p6) }
  0x81   : > { %v669_v10 = vsel %vm631_vm4, %v1330_v60, 0.0  ;;  %v701_v45 = vadd.f32 %v700_v51, %v699_v19  ;;  %v735_v13 = vsel %vm330_vm1, %v662_v31, 0.0  ;;  %v1062_v59 = vpop.eup %1061  ;;  %vm635_vm8 = vcmp.eq.s32.totalorder %v1500_v8, 18 }
  0x82   : > { %v666_v37 = vsel %vm628_vm5, %v1350_v20, 0.0  ;;  %v704_v15 = vsel %vm330_vm1, %v667_v4, 0.0  ;;  %v734_v50 = vadd.f32 %v733_v42, %v732_v36  ;;  %vm632_vm9 = vcmp.eq.s32.totalorder %v1503_v48, 16 }
  0x83   : > { %v671_v9 = vsel %vm633_vm6, %v1365_v32, 0.0  ;;  %v703_v6 = vadd.f32 %v702_v57, %v701_v45  ;;  %v737_v11 = vsel %vm330_vm1, %v664_v55, 0.0  ;;  %vm634_vm10 = vcmp.eq.s32.totalorder %v1503_v48, 17 }
  0x84   : > { %v668_v60 = vsel %vm630_vm7, %v1359_v27, 0.0  ;;  %v706_v25 = vsel %vm330_vm1, %v669_v10, 0.0  ;;  %v736_v52 = vadd.f32 %v735_v13, %v734_v50  ;;  %v594_v62 = vmul.f32 0.6931472, %v1062_v59 }
  0x85   : > { %v673_v20 = vsel %vm635_vm8, %v1370_v39, 0.0  ;;  %v705_v12 = vadd.f32 %v704_v15, %v703_v6  ;;  %v739_v16 = vsel %vm330_vm1, %v666_v37, 0.0  ;;  %v670_v7 = vsel %vm632_vm9, %v1362_v28, 0.0 }
  0x86   : > { %v708_v32 = vsel %vm330_vm1, %v671_v9, 0.0  ;;  %v738_v14 = vadd.f32 %v737_v11, %v736_v52  ;;  %v1064_v18 = vpop.eup %1063  ;;  %vm636_vm11 = vcmp.eq.s32.totalorder %v1503_v48, 18  ;;  %v741_v27 = vsel %vm330_vm1, %v668_v60, 0.0 }
  0x87   : > { %v707_v21 = vadd.f32 %v706_v25, %v705_v12  ;;  %v672_v17 = vsel %vm634_vm10, %v1379_v46, 0.0  ;;  %v710_v54 = vsel %vm330_vm1, %v673_v20, 0.0  ;;  %v597_v39 = vadd.f32 %v594_v62, %v1398_v38 }
  0x88   : > { %v740_v22 = vadd.f32 %v739_v16, %v738_v14  ;;  %v743_v56 = vsel %vm330_vm1, %v670_v7, 0.0  ;;  %v596_v28 = vmul.f32 0.6931472, %v1064_v18  ;;  %v674_v47 = vsel %vm636_vm11, %v1382_v49, 0.0 }
  0x89   : > { %v709_v23 = vadd.f32 %v708_v32, %v707_v21  ;;  %v745_v29 = vsel %vm330_vm1, %v672_v17, 0.0  ;;  %v747_v40 = vsel %vm330_vm1, %v674_v47, 0.0  ;;  %v794_v43 = vsel (%p771_p6), %vm330_vm1, %v792_v3, 0.0 }
  0x8a   : > { %v742_v58 = vadd.f32 %v741_v27, %v740_v22  ;;  %v598_v35 = vadd.f32 %v596_v28, %v1400_v34  ;;  %v795_v48 = vsel (%p771_p6), %vm330_vm1, %v793_v63, 0.0 }
  0x8b   : > { %v711_v24 = vadd.f32 %v710_v54, %v709_v23  ;;  %v796_v51 = vadd.f32 (%p771_p6), %v795_v48, %v794_v43 }
  0x8c   : > { %v744_v26 = vadd.f32 %v743_v56, %v742_v58 }
  0x8d   : > { %v753_v46 = vsub.f32 %v597_v39, %v711_v24 }
  0x8e   : > { %v746_v53 = vadd.f32 %v745_v29, %v744_v26 }
  0x8f   : > { %v755_v38 = vsel %vm749_vm14, %v753_v46, 0.0 }
  0x90   : > { %v748_v44 = vadd.f32 %v747_v40, %v746_v53  ;;  %v757_v61 = vadd.f32 %v755_v38, %v751_v33 }
  0x91   : > { %775 = sbr.rel (!%p771_p6) target bundleno = 372 (0x174), region = 36 }
  0x92   : > { %v754_v1 = vsub.f32 %v598_v35, %v748_v44  ;;  %759 = vst.msk [vmem:[#allocation2] sm:$0xff] %vm330_vm1, %v757_v61 }
  0x94   : > { %v756_v49 = vsel %vm750_vm15, %v754_v1, 0.0 }
  0x95   : > { %v758_v0 = vadd.f32 %v756_v49, %v752_v30 }
  0x97   : > { %760 = vst.msk [vmem:[#allocation2 + $0x8] sm:$0xff] %vm330_vm1, %v758_v0 }
  0x99   : > { %v776_v34 = vld [vmem:[#allocation2] sm:$0xff] }
  0x9a   : > { %v778_v8 = vsel %vm330_vm1, %v776_v34, 0.0 }
  0x9e   : > { %v777_v41 = vld [vmem:[#allocation2 + $0x8] sm:$0xff] }
  0x9f   : > { %v779_v5 = vsel %vm330_vm1, %v777_v41, 0.0 }
  0xa0   : > { %v780_v31 = vadd.f32 %v779_v5, %v778_v8 }
  0xa2   : > { %781 = vadd.xlane.f32.xlu0 %v780_v31 }
  0xa6   : > { %797 = vadd.xlane.f32.xlu0 %v796_v51 }
 0x12f   : > { %v782_v2 = vpop.xlane.xlu0 %781 }
 0x130   : > { %v783_v4 = vrot.slane %v782_v2, 4 }
 0x132   : > { %v784_v19 = vadd.f32 %v783_v4, %v782_v2 }
 0x133   : > { %v798_v42 = vpop.xlane.xlu0 %797 }
 0x134   : > { %v785_v55 = vrot.slane %v784_v19, 2  ;;  %v799_v57 = vrot.slane %v798_v42, 4 }
 0x136   : > { %v800_v36 = vadd.f32 %v799_v57, %v798_v42  ;;  %v786_v10 = vadd.f32 %v785_v55, %v784_v19 }
 0x138   : > { %v801_v45 = vrot.slane %v800_v36, 2  ;;  %v787_v13 = vrot.slane %v786_v10, 1 }
 0x13a   : > { %v802_v59 = vadd.f32 %v801_v45, %v800_v36  ;;  %v788_v37 = vadd.f32 %v787_v13, %v786_v10 }
 0x13c   : > { %941 = vpush %v788_v37  ;;  %v803_v15 = vrot.slane %v802_v59, 1 }
 0x13e   : > { %v804_v50 = vadd.f32 %v803_v15, %v802_v59 }
 0x140   : > { %943 = vpush %v804_v50 }
 0x16d   : > { %s942_s26 = spop %941 }
 0x16e   : > { %v790_v9 = vstv %s942_s26 }
 0x16f   : > { %791 = vst [vmem:[#allocation4] sm:$0x1] %v790_v9 }
 0x171   : > { %s944_s27 = spop %943 }
 0x172   : > { %v806_v6 = vstv %s944_s27 }
 0x173   : > { %807 = vst [vmem:[#allocation6] sm:$0x1] %v806_v6 }
 0x174 PF: > { %p1716_p7 = scmp.eq.s32.totalorder %s920_s15, 1  ;;  %s1151_s29 = smov [#allocation4]  }
 0x175   : > { %s817_s30 = sshll.u32 %s1151_s29, 4  ;;  %s1152_s4 = smov [#allocation6]   ;;  %s818_s30 = int_to_ptr.vmem [resolvable:$true] %s817_s30 }
 0x176   : > { %s830_s5 = sshll.u32 %s1152_s4, 4  ;;  %s1065_s6 = scalar_lea.vmem %s818_s30, 16  ;;  %s1720_s5 = int_to_ptr.vmem [resolvable:$true] %s830_s5 }
 0x177   : > { %p1066_p8 = scmp.ne.s32.totalorder %s818_s30, %s1065_s6  ;;  %s1071_s7 = scalar_lea.vmem %s818_s30, 32 }
 0x178   : > { %p1072_p11 = scmp.lt.s32.totalorder %s818_s30, %s818_s30  ;;  %p1073_p12 = scmp.lt.s32.totalorder %s1071_s7, %s1065_s6 }
 0x179   : > { %p1067_p9 = pnand %p1066_p8, %p1716_p7 }
 0x17a   : > { %p1074_p13 = por %p1073_p12, %p1072_p11 }
 0x17b   : > { %p1068_p10 = pneg %p1067_p9 }
 0x17d   : > { %p1075_p0 = pnand %p1074_p13, %p1068_p10 }
 0x17f   : > { %1078 = shalt.err (!%p1075_p0)
}
 0x180   : > { %s1079_s10 = scalar_lea.hbm %s1783_s2, 16 }
 0x181   : > { %p1080_p1 = scmp.ne.s32.totalorder %s1783_s2, %s1079_s10  ;;  %p1085_p4 = scmp.lt.u32.totalorder %s1079_s10, %s1783_s2 }
 0x183   : > { %p1081_p2 = pnand %p1080_p1, %p1716_p7 }
 0x185   : > { %p1082_p3 = pneg %p1081_p2 }
 0x187   : > { %p1087_p5 = pnand %p1085_p4, %p1082_p3 }
 0x189   : > { %1090 = shalt.err (!%p1087_p5)
}
 0x18a   : > { %946 = dma.vmem_to_hbm [thread:$0]  (%p1716_p7), %s818_s30, 16, %s1783_s2, [#allocation5]  }
 0x18b   : > { %s1091_s20 = scalar_lea.vmem %s1720_s5, 16  ;;  %s1097_s21 = scalar_lea.vmem %s1720_s5, 32 }
 0x18c   : > { %p1092_p6 = scmp.ne.s32.totalorder %s1720_s5, %s1091_s20  ;;  %p1098_p10 = scmp.lt.s32.totalorder %s1720_s5, %s1720_s5 }
 0x18d   : > { %p1099_p11 = scmp.lt.s32.totalorder %s1097_s21, %s1091_s20 }
 0x18e   : > { %p1093_p8 = pnand %p1092_p6, %p1716_p7 }
 0x18f   : > { %p1100_p12 = por %p1099_p11, %p1098_p10 }
 0x190   : > { %p1094_p9 = pneg %p1093_p8 }
 0x192   : > { %p1101_p13 = pnand %p1100_p12, %p1094_p9 }
 0x194   : > { %1104 = shalt.err (!%p1101_p13)
}
 0x195   : > { %s1105_s24 = scalar_lea.hbm %s1784_s3, 16 }
 0x196   : > { %p1106_p0 = scmp.ne.s32.totalorder %s1784_s3, %s1105_s24  ;;  %p1111_p3 = scmp.lt.u32.totalorder %s1105_s24, %s1784_s3 }
 0x198   : > { %p1107_p1 = pnand %p1106_p0, %p1716_p7 }
 0x19a   : > { %p1108_p2 = pneg %p1107_p1 }
 0x19c   : > { %p1113_p4 = pnand %p1111_p3, %p1108_p2 }
 0x19e   : > { %1116 = shalt.err (!%p1113_p4)
}
 0x19f   : > { %948 = dma.vmem_to_hbm [thread:$0]  (%p1716_p7), %s1720_s5, 16, %s1784_s3, [#allocation7]  }
 0x1a0   : > { %1130 = dma.done.wait (%p1716_p7), [#allocation5], 16  }
 0x1a1   : > { %1132 = vsyncadd (%p1716_p7), [#allocation5], 4294967280 }
 0x1a2   : > { %1134 = dma.done.wait (%p1716_p7), [#allocation7], 16  }
 0x1a3   : > { %1136 = vsyncadd (%p1716_p7), [#allocation7], 4294967280 }
 0x1a4 PF: > { %s16_s14 = sadd.s32 1, %s1147_s14   ;;  %s1811_s12 = smov %s1143_s13 }
 0x1a5   : > { %p13_p5 = scmp.ge.s32.totalorder %s16_s14, 4   ;;  %s1812_s13 = smov %s1814_s16 }
 0x1a7   :  { %15 = sbr.rel (!%p13_p5) target bundleno = 3 (0x3), region = 76 }
 0x1ae   :  { %847 = vsyncpa [#allocation5], 1 }
 0x1af   :  { %849 = vsyncpa [#allocation5 + $0x1], 1 }
 0x1b0   :  { %850 = vsyncpa [#allocation7], 1 }

</bundles_post_ra>
